<compile_context>
chip_gen: v7x
topology: tpu7x:2x2x1
jax: 0.10.0
libtpu: 0.0.40
codegen_flags: <defaults>
</compile_context>

<pallas_src>
import functools

import jax
import jax.numpy as jnp
from jax.experimental import pallas as pl
from jax.experimental.pallas import tpu as pltpu


def _linear_plus1_kernel(w_ref, b_ref, x_ref, o_ref, *, fuse_identical_rows):
    """One grid step of  out = W @ x + b_eff  with batch on the lane axis.

    w_ref: (2, 3)      f32 SMEM -- PyTorch Linear weight layout (out, in)
    b_ref: (2,)        f32 SMEM -- bias with the "+1" already folded in
    x_ref: (3, S, 128) f32 VMEM -- input features, batch = S*128 lanes
    o_ref: (2, S, 128) f32 VMEM -- output features
    """
    # Dense (S, 128) slabs: full sublane occupancy, unmasked vector stores.
    x0 = x_ref[0]
    x1 = x_ref[1]
    x2 = x_ref[2]

    # Hoist the scalar splats once per grid step (scalar path -> VPU splat).
    w00 = w_ref[0, 0]
    w01 = w_ref[0, 1]
    w02 = w_ref[0, 2]
    b0 = b_ref[0]
    b1 = b_ref[1]

    if fuse_identical_rows:
        # Both weight rows are identical (this model: all 0.3) -> share the
        # matvec accumulation between the two output rows (3 muls instead of 6).
        acc = w00 * x0 + w01 * x1 + w02 * x2
        o_ref[0] = acc + b0
        o_ref[1] = acc + b1
    else:
        w10 = w_ref[1, 0]
        w11 = w_ref[1, 1]
        w12 = w_ref[1, 2]
        o_ref[0] = w00 * x0 + w01 * x1 + w02 * x2 + b0
        o_ref[1] = w10 * x0 + w11 * x1 + w12 * x2 + b1


def model_forward(x, w, b, *, max_rows_per_block=1024,
                  fuse_identical_rows=None, feature_major_output=False):
    """x: (B, 3) f32, w: (2, 3) f32, b: (2,) f32  ->  (B, 2) f32.

    max_rows_per_block: number of 128-lane rows per grid step (multiple of 8).
      1024 rows -> 1.5 MiB x-block / 1 MiB out-block; ~5 MiB double-buffered.
    """
    B, K = x.shape
    N = w.shape[0]

    # v2 = v1 - (-1) folded into the bias (removes one full-tile VPU add).
    b_eff = b.astype(jnp.float32) + 1.0

    if fuse_identical_rows is None:
        # Auto-detect only when the weight is concrete; fall back to the
        # general 6-FMA path under tracing.
        try:
            fuse_identical_rows = bool(jnp.all(w[0] == w[1]))
        except jax.errors.ConcretizationTypeError:
            fuse_identical_rows = False

    # ---- batch -> (sublane-dense rows, 128 lanes) layout --------------------
    LANES = 128
    SUB = 8
    rows = pl.cdiv(B, LANES)                       # 128-lane rows needed
    # Block height: multiple of 8 sublanes, capped for VMEM / pipelining.
    max_rows_per_block = max(SUB, (max_rows_per_block // SUB) * SUB)
    S = min(max_rows_per_block, pl.cdiv(rows, SUB) * SUB)
    rows_pad = pl.cdiv(rows, S) * S
    B_pad = rows_pad * LANES

    # Single pad of the feature-major view; the reshape to (K, rows_pad, 128)
    # is contiguity-preserving (free).
    xt = jnp.pad(x.astype(jnp.float32).T, ((0, 0), (0, B_pad - B)))
    xt = xt.reshape(K, rows_pad, LANES)

    out = pl.pallas_call(
        functools.partial(_linear_plus1_kernel,
                          fuse_identical_rows=fuse_identical_rows),
        out_shape=jax.ShapeDtypeStruct((N, rows_pad, LANES), jnp.float32),
        grid=(rows_pad // S,),
        in_specs=[
            pl.BlockSpec(memory_space=pltpu.MemorySpace.SMEM),   # weight (2, 3)
            pl.BlockSpec(memory_space=pltpu.MemorySpace.SMEM),   # bias_eff (2,)
            pl.BlockSpec((K, S, LANES), lambda i: (0, i, 0)),    # x slab
        ],
        out_specs=pl.BlockSpec((N, S, LANES), lambda i: (0, i, 0)),
        compiler_params=pltpu.CompilerParams(
            dimension_semantics=("parallel",)),
    )(w.astype(jnp.float32), b_eff, xt)

    out = out.reshape(N, B_pad)[:, :B]             # (2, B) feature-major
    if feature_major_output:
        return out
    # Match the PyTorch module's (B, 2) layout.
    # TODO(synk): if the downstream consumer can take feature-major (2, B),
    #             pass feature_major_output=True and skip this transpose.
    return out.T


if __name__ == "__main__":
    key = jax.random.PRNGKey(0)

    # Small shapes consistent with the module: in_features=3, out_features=2.
    batch = 4
    x1 = jax.random.normal(key, (batch, 3), dtype=jnp.float32)

    # Deterministic parameters, exactly as the module's __init__ sets them.
    weight = jnp.full((2, 3), 0.3, dtype=jnp.float32)
    bias = jnp.array([-1.0, 1.0], dtype=jnp.float32)

    out = model_forward(x1, weight, bias)
    out = jax.block_until_ready(out)

    # Reference check in plain JAX (v1 = x @ W.T + b ; v2 = v1 + 1).
    ref = (x1 @ weight.T + bias) + 1.0
    assert out.shape == (batch, 2)
    assert jnp.allclose(out, ref, atol=1e-5, rtol=1e-5)

    # Also exercise the general (non-fused) path for correctness.
    out_general = jax.block_until_ready(
        model_forward(x1, weight, bias, fuse_identical_rows=False))
    assert jnp.allclose(out_general, ref, atol=1e-5, rtol=1e-5)

    print("KERNEL_OK")
</pallas_src>

<mosaic_0001>
module attributes {stable_mosaic.version = 11 : i64} {
  func.func @_linear_plus1_kernel(%arg0: i32, %arg1: memref<2x3xf32, #tpu.memory_space<smem>>, %arg2: memref<2xf32, #tpu.memory_space<smem>>, %arg3: memref<3x8x128xf32, #tpu.memory_space<vmem>>, %arg4: memref<2x8x128xf32, #tpu.memory_space<vmem>>) attributes {dimension_semantics = [#tpu.dimension_semantics<parallel>], iteration_bounds = array<i64: 1>, scalar_prefetch = 0 : i64, scratch_operands = 0 : i64, tpu.core_type = #tpu.core_type<tc>, window_params = [{transform_indices = @transform_0, window_bounds = array<i64: 2, 3>}, {transform_indices = @transform_1, window_bounds = array<i64: 2>}, {transform_indices = @transform_2, window_bounds = array<i64: 3, 8, 128>}, {transform_indices = @transform_3, window_bounds = array<i64: 2, 8, 128>}]} {
    %c0 = arith.constant 0 : index
    %c0_0 = arith.constant 0 : index
    %c0_1 = arith.constant 0 : index
    %0 = vector.load %arg3[%c0, %c0_0, %c0_1] : memref<3x8x128xf32, #tpu.memory_space<vmem>>, vector<1x8x128xf32>
    %1 = vector.shape_cast %0 : vector<1x8x128xf32> to vector<8x128xf32>
    %c1 = arith.constant 1 : index
    %c0_2 = arith.constant 0 : index
    %c0_3 = arith.constant 0 : index
    %2 = vector.load %arg3[%c1, %c0_2, %c0_3] : memref<3x8x128xf32, #tpu.memory_space<vmem>>, vector<1x8x128xf32>
    %3 = vector.shape_cast %2 : vector<1x8x128xf32> to vector<8x128xf32>
    %c2 = arith.constant 2 : index
    %c0_4 = arith.constant 0 : index
    %c0_5 = arith.constant 0 : index
    %4 = vector.load %arg3[%c2, %c0_4, %c0_5] : memref<3x8x128xf32, #tpu.memory_space<vmem>>, vector<1x8x128xf32>
    %5 = vector.shape_cast %4 : vector<1x8x128xf32> to vector<8x128xf32>
    %c0_6 = arith.constant 0 : index
    %c0_7 = arith.constant 0 : index
    %6 = memref.load %arg1[%c0_6, %c0_7] : memref<2x3xf32, #tpu.memory_space<smem>>
    %c0_8 = arith.constant 0 : index
    %c1_9 = arith.constant 1 : index
    %7 = memref.load %arg1[%c0_8, %c1_9] : memref<2x3xf32, #tpu.memory_space<smem>>
    %c0_10 = arith.constant 0 : index
    %c2_11 = arith.constant 2 : index
    %8 = memref.load %arg1[%c0_10, %c2_11] : memref<2x3xf32, #tpu.memory_space<smem>>
    %c0_12 = arith.constant 0 : index
    %9 = memref.load %arg2[%c0_12] : memref<2xf32, #tpu.memory_space<smem>>
    %c1_13 = arith.constant 1 : index
    %10 = memref.load %arg2[%c1_13] : memref<2xf32, #tpu.memory_space<smem>>
    %11 = vector.broadcast %6 : f32 to vector<8x128xf32>
    %12 = arith.mulf %11, %1 : vector<8x128xf32>
    %13 = vector.broadcast %7 : f32 to vector<8x128xf32>
    %14 = arith.mulf %13, %3 : vector<8x128xf32>
    %15 = arith.addf %12, %14 : vector<8x128xf32>
    %16 = vector.broadcast %8 : f32 to vector<8x128xf32>
    %17 = arith.mulf %16, %5 : vector<8x128xf32>
    %18 = arith.addf %15, %17 : vector<8x128xf32>
    %19 = vector.broadcast %9 : f32 to vector<8x128xf32>
    %20 = arith.addf %18, %19 : vector<8x128xf32>
    %c0_14 = arith.constant 0 : index
    %c0_15 = arith.constant 0 : index
    %c0_16 = arith.constant 0 : index
    %21 = vector.load %arg4[%c0_14, %c0_15, %c0_16] : memref<2x8x128xf32, #tpu.memory_space<vmem>>, vector<1x8x128xf32>
    %22 = vector.shape_cast %21 : vector<1x8x128xf32> to vector<8x128xf32>
    %23 = vector.shape_cast %20 : vector<8x128xf32> to vector<1x8x128xf32>
    tpu.vector_store %arg4[%c0_14, %c0_15, %c0_16], %23 {strides = array<i32>} : memref<2x8x128xf32, #tpu.memory_space<vmem>>, vector<1x8x128xf32>,
    %24 = vector.broadcast %10 : f32 to vector<8x128xf32>
    %25 = arith.addf %18, %24 : vector<8x128xf32>
    %c1_17 = arith.constant 1 : index
    %c0_18 = arith.constant 0 : index
    %c0_19 = arith.constant 0 : index
    %26 = vector.load %arg4[%c1_17, %c0_18, %c0_19] : memref<2x8x128xf32, #tpu.memory_space<vmem>>, vector<1x8x128xf32>
    %27 = vector.shape_cast %26 : vector<1x8x128xf32> to vector<8x128xf32>
    %28 = vector.shape_cast %25 : vector<8x128xf32> to vector<1x8x128xf32>
    tpu.vector_store %arg4[%c1_17, %c0_18, %c0_19], %28 {strides = array<i32>} : memref<2x8x128xf32, #tpu.memory_space<vmem>>, vector<1x8x128xf32>,
    return
  }
  func.func @transform_0(%arg0: i32) -> (i32, i32) {
    %c0_i32 = arith.constant 0 : i32
    %c0_i32_0 = arith.constant 0 : i32
    %c0_i32_1 = arith.constant 0 : i32
    return %c0_i32, %c0_i32_0 : i32, i32
  }
  func.func @transform_1(%arg0: i32) -> i32 {
    %c0_i32 = arith.constant 0 : i32
    %c0_i32_0 = arith.constant 0 : i32
    return %c0_i32 : i32
  }
  func.func @transform_2(%arg0: i32) -> (i32, i32, i32) {
    %c0_i32 = arith.constant 0 : i32
    %c0_i32_0 = arith.constant 0 : i32
    %c0_i32_1 = arith.constant 0 : i32
    return %c0_i32, %arg0, %c0_i32_0 : i32, i32, i32
  }
  func.func @transform_3(%arg0: i32) -> (i32, i32, i32) {
    %c0_i32 = arith.constant 0 : i32
    %c0_i32_0 = arith.constant 0 : i32
    %c0_i32_1 = arith.constant 0 : i32
    return %c0_i32, %arg0, %c0_i32_0 : i32, i32, i32
  }
}

</mosaic_0001>

<bundles_post_ra>
// kernel: tpu_custom_call.1
= control target key start
LH: loop header
LB: loop body
LE: loop exit
PB: predicated region body
PF: predicated region fallthrough
CT: control target
= control target key end

     0   :  { %8 = vsyncpa [#allocation5], 0  ;;  %s250_s0 = inlined_call_operand.hbm [shape: f32[2,3], index: 0, kind: input, shape index: {}]   ;;  %s251_s1 = inlined_call_operand.vmem [shape: f32[2], index: 1, kind: input, shape index: {}]   ;;  %s252_s2 = inlined_call_operand.hbm [shape: f32[3,8,128], index: 2, kind: input, shape index: {}]   ;;  %s253_s3 = inlined_call_operand.hbm [shape: f32[2,8,128], index: 3, kind: output, shape index: {}]  }
   0x1   :  { %9 = vsyncpa [#allocation6], 0 }
   0x2   :  { %10 = vsyncpa [#allocation3], 0 }
   0x3   :  { %11 = vsyncpa [#allocation4], 0  ;;  %s26_s14 = sshll.u32 %s251_s1, 4  ;;  %s105_s17 = scalar_lea.hbm %s250_s0, 32  ;;  %s27_s14 = int_to_ptr.vmem [resolvable:$true] %s26_s14 }
   0x4   :  { %p106_p0 = scmp.ne.s32.totalorder %s250_s0, %s105_s17  ;;  %p109_p1 = scmp.lt.u32.totalorder %s105_s17, %s250_s0 }
   0x6   :  { %p111_p2 = pnand %p109_p1, %p106_p0 }
   0x8   :  { %114 = shalt.err (!%p111_p2)
}
   0x9   :  { %s179_s22 = smov [#allocation2]   ;;  %s115_s1 = scalar_lea.vmem %s27_s14, 16 }
   0xa   :  { %19 = dma.hbm_to_smem %s250_s0, 32, %s179_s22, [#allocation5]  }
   0xb   :  { %p116_p3 = scmp.ne.s32.totalorder %s27_s14, %s115_s1  ;;  %p120_p4 = scmp.lt.s32.totalorder %s27_s14, %s27_s14 }
   0xc   :  { %p121_p5 = scmp.lt.s32.totalorder %s115_s1, %s115_s1 }
   0xe   :  { %p122_p6 = por %p121_p5, %p120_p4 }
  0x10   :  { %p123_p7 = pnand %p122_p6, %p116_p3 }
  0x12   :  { %126 = shalt.err (!%p123_p7)
}
  0x13   :  { %s180_s25 = smov [#allocation7]   ;;  %s181_s26 = smov [#allocation8]  }
  0x14   :  { %29 = dma.vmem_to_smem %s27_s14, 16, %s180_s25, [#allocation6]  }
  0x15   :  { %s35_s27 = sshll.u32 %s181_s26, 4  ;;  %s127_s30 = scalar_lea.hbm %s252_s2, 384  ;;  %s36_s27 = int_to_ptr.vmem [resolvable:$true] %s35_s27 }
  0x16   :  { %p128_p8 = scmp.ne.s32.totalorder %s252_s2, %s127_s30  ;;  %p131_p9 = scmp.lt.u32.totalorder %s127_s30, %s252_s2 }
  0x18   :  { %p133_p10 = pnand %p131_p9, %p128_p8 }
  0x1a   :  { %136 = shalt.err (!%p133_p10)
}
  0x1b   :  { %s137_s7 = scalar_lea.vmem %s36_s27, 384  ;;  %p142_p12 = scmp.lt.s32.totalorder %s36_s27, %s36_s27 }
  0x1c   :  { %p138_p11 = scmp.ne.s32.totalorder %s36_s27, %s137_s7  ;;  %p143_p13 = scmp.lt.s32.totalorder %s137_s7, %s137_s7 }
  0x1e   :  { %p144_p0 = por %p143_p13, %p142_p12 }
  0x20   :  { %p145_p1 = pnand %p144_p0, %p138_p11 }
  0x22   :  { %148 = shalt.err (!%p145_p1)
}
  0x23   :  { %s182_s8 = smov 128   ;;  %s183_s9 = smov 8  }
  0x24   :  { %41 = dma.hbm_to_vmem [thread:$0]  %s252_s2, 384, %s36_s27, [#allocation3], %s182_s8, %s182_s8, %s183_s9  }
  0x25   :  { %171 = dma.done.wait [#allocation5], 32  }
  0x26   :  { %172 = vsyncadd [#allocation5], 4294967264 }
  0x27   :  { %173 = dma.done.wait [#allocation6], 16  }
  0x28   :  { %174 = vsyncadd [#allocation6], 4294967280 }
  0x29   :  { %175 = dma.done.wait [#allocation3], 384  }
  0x2a   :  { %176 = vsyncadd [#allocation3], 4294966912 }
  0x2b   :  { %51 = sfence }
  0x2c   :  { %s57_s12 = sld [smem:[#allocation2]]  ;;  %s96_s13 = sld [smem:[#allocation2 + $0x1]]  ;;  %v52_v0 = vld [vmem:[#allocation8] sm:$0xff]  ;;  %v54_v1 = vld [vmem:[#allocation8 + $0x8] sm:$0xff]  ;;  %v56_v2 = vld [vmem:[#allocation8 + $0x10] sm:$0xff] }
  0x2d   :  { %s97_s14 = sld [smem:[#allocation2 + $0x2]]  ;;  %s60_s15 = sld [smem:[#allocation7]] }
  0x2e   :  { %s98_s16 = sld [smem:[#allocation7 + $0x1]]  ;;  %s184_s2 = smov [#allocation9]  }
  0x2f   :  { %s82_s17 = sshll.u32 %s184_s2, 4  ;;  %s83_s17 = int_to_ptr.vmem [resolvable:$true] %s82_s17 }
  0x30   :  { %s149_s18 = scalar_lea.vmem %s83_s17, 256  ;;  %p154_p3 = scmp.lt.s32.totalorder %s83_s17, %s83_s17 }
  0x31   :  { %p150_p2 = scmp.ne.s32.totalorder %s83_s17, %s149_s18  ;;  %p155_p4 = scmp.lt.s32.totalorder %s149_s18, %s149_s18 }
  0x32   :  { %v62_v3 = vstv %s57_s12  ;;  %v64_v5 = vstv %s96_s13 }
  0x33   :  { %v63_v4 = vmul.f32 %v62_v3, %v52_v0  ;;  %v67_v6 = vstv %s97_s14  ;;  %v65_v7 = vmul.f32 %v64_v5, %v54_v1  ;;  %v70_v10 = vstv %s60_s15  ;;  %p156_p5 = por %p155_p4, %p154_p3 }
  0x34   :  { %v68_v8 = vmul.f32 %v67_v6, %v56_v2  ;;  %v73_v11 = vstv %s98_s16 }
  0x35   :  { %v66_v9 = vadd.f32 %v65_v7, %v63_v4  ;;  %p157_p6 = pnand %p156_p5, %p150_p2 }
  0x37   :  { %v69_v12 = vadd.f32 %v68_v8, %v66_v9 }
  0x39   :  { %v71_v13 = vadd.f32 %v70_v10, %v69_v12  ;;  %v74_v14 = vadd.f32 %v73_v11, %v69_v12 }
  0x3b   :  { %72 = vst [vmem:[#allocation9] sm:$0xff] %v71_v13  ;;  %76 = vst [vmem:[#allocation9 + $0x8] sm:$0xff] %v74_v14 }
  0x3c   :  { %160 = shalt.err (!%p157_p6)
}
  0x3d   :  { %s161_s21 = scalar_lea.hbm %s253_s3, 256 }
  0x3e   :  { %p162_p7 = scmp.ne.s32.totalorder %s253_s3, %s161_s21  ;;  %p165_p8 = scmp.lt.u32.totalorder %s161_s21, %s253_s3 }
  0x40   :  { %p167_p9 = pnand %p165_p8, %p162_p7 }
  0x42   :  { %170 = shalt.err (!%p167_p9)
}
  0x43   :  { %88 = dma.vmem_to_hbm [thread:$0]  %s83_s17, 256, %s253_s3, [#allocation4], %s182_s8, %s182_s8, %s183_s9  }
  0x44   :  { %177 = dma.done.wait [#allocation4], 256  }
  0x45   :  { %178 = vsyncadd [#allocation4], 4294967040 }
  0x46   :  { %92 = vsyncpa [#allocation3], 1 }
  0x47   :  { %93 = vsyncpa [#allocation4], 1 }
  0x48   :  { %94 = vsyncpa [#allocation5], 1 }
  0x49   :  { %95 = vsyncpa [#allocation6], 1 }

</bundles_post_ra>
